<compile_context>
chip_gen: v6e
topology: v6e:2x2x1
jax: 0.10.0
libtpu: 0.0.40
codegen_flags: <defaults>
</compile_context>

<pallas_src>
import jax
import jax.numpy as jnp
from jax.experimental import pallas as pl
from jax.experimental.pallas import tpu as pltpu

IN = 81          # in_features of hidden1
HID = 9 * 9 * 8  # 648 hidden units
OUT = 1          # predict out_features

IN_P = 128       # 81  -> 128  (lane-aligned)
HID_P = 768      # 648 -> 768  (multiple of 128)
OUT_P = 128      # 1   -> 128  (lane-dense output)


# ----------------------------------------------------------------------------
# Fused MLP kernel: relu(x @ W1 + b1) @ W2 + b2, everything resident in VMEM.
# ----------------------------------------------------------------------------
def mlp_kernel(x_ref, w1_ref, b1_ref, w2_ref, b2_ref, o_ref):
    # x: (M, IN_P), w1: (IN_P, HID_P), b1: (1, HID_P)
    # w2: (HID_P, OUT_P), b2: (1, OUT_P), o: (M, OUT_P)
    h = jnp.dot(x_ref[...], w1_ref[...], preferred_element_type=jnp.float32)
    h = jnp.maximum(h + b1_ref[...], 0.0)
    o = jnp.dot(h, w2_ref[...], preferred_element_type=jnp.float32)
    o_ref[...] = o + b2_ref[...]


def model11_forward(x, params):
    """x: (N, 81) -> (N, 1).  Mirrors model_11.forward."""
    N = x.shape[0]
    xp = jnp.pad(x, ((0, 0), (0, IN_P - IN)))  # tiny (N x 128) activation pad
    out = pl.pallas_call(
        mlp_kernel,
        out_shape=jax.ShapeDtypeStruct((N, OUT_P), jnp.float32),
        in_specs=[pl.BlockSpec(memory_space=pltpu.MemorySpace.VMEM)] * 5,
        out_specs=pl.BlockSpec(memory_space=pltpu.MemorySpace.VMEM),
    )(xp, params["w1"], params["b1"], params["w2"], params["b2"])
    return out[:, :OUT]


# ----------------------------------------------------------------------------
# Deterministic parameter init (PyTorch-like uniform(-1/sqrt(fan_in), ...)).
# Weights are stored (in, out) and pre-padded to lane-aligned shapes ONCE here,
# so nothing is padded/transposed inside the jitted forward.
# ----------------------------------------------------------------------------
def init_params(key):
    k1, k2, k3, k4 = jax.random.split(key, 4)
    bound1 = 1.0 / (IN ** 0.5)
    w1 = jax.random.uniform(k1, (IN, HID), jnp.float32, -bound1, bound1)
    b1 = jax.random.uniform(k2, (HID,), jnp.float32, -bound1, bound1)
    bound2 = 1.0 / (HID ** 0.5)
    w2 = jax.random.uniform(k3, (HID, OUT), jnp.float32, -bound2, bound2)
    b2 = jax.random.uniform(k4, (OUT,), jnp.float32, -bound2, bound2)
    return {
        "w1": jnp.pad(w1, ((0, IN_P - IN), (0, HID_P - HID))),
        "b1": jnp.pad(b1.reshape(1, HID), ((0, 0), (0, HID_P - HID))),
        "w2": jnp.pad(w2, ((0, HID_P - HID), (0, OUT_P - OUT))),
        "b2": jnp.pad(b2.reshape(1, OUT), ((0, 0), (0, OUT_P - OUT))),
    }


if __name__ == "__main__":
    key = jax.random.PRNGKey(0)
    k_param, k_x = jax.random.split(key)
    params = init_params(k_param)
    # forward implies a flat 81-feature input; batch = 2
    x = jax.random.normal(k_x, (2, IN), dtype=jnp.float32)

    fwd = jax.jit(model11_forward)
    out = jax.block_until_ready(fwd(x, params))

    assert out.shape == (2, 1), out.shape
    assert bool(jnp.all(jnp.isfinite(out)))

    # pure-JAX reference check against the unpadded weights
    w1 = params["w1"][:IN, :HID]
    b1 = params["b1"][0, :HID]
    w2 = params["w2"][:HID, :OUT]
    b2 = params["b2"][0, :OUT]
    ref = jnp.maximum(x @ w1 + b1, 0.0) @ w2 + b2
    assert bool(jnp.allclose(out, ref, atol=1e-4, rtol=1e-4))

    print("KERNEL_OK")
</pallas_src>

<mosaic_0001>
module attributes {stable_mosaic.version = 11 : i64} {
  func.func @mlp_kernel(%arg0: memref<2x128xf32, #tpu.memory_space<vmem>>, %arg1: memref<128x768xf32, #tpu.memory_space<vmem>>, %arg2: memref<1x768xf32, #tpu.memory_space<vmem>>, %arg3: memref<768x128xf32, #tpu.memory_space<vmem>>, %arg4: memref<1x128xf32, #tpu.memory_space<vmem>>, %arg5: memref<2x128xf32, #tpu.memory_space<vmem>>) attributes {dimension_semantics = [], scalar_prefetch = 0 : i64, scratch_operands = 0 : i64, tpu.core_type = #tpu.core_type<tc>} {
    %c0 = arith.constant 0 : index
    %c0_0 = arith.constant 0 : index
    %0 = vector.load %arg0[%c0, %c0_0] : memref<2x128xf32, #tpu.memory_space<vmem>>, vector<2x128xf32>
    %c0_1 = arith.constant 0 : index
    %c0_2 = arith.constant 0 : index
    %1 = vector.load %arg1[%c0_1, %c0_2] : memref<128x768xf32, #tpu.memory_space<vmem>>, vector<128x768xf32>
    %cst = arith.constant dense<0.000000e+00> : vector<2x768xf32>
    %2 = tpu.matmul %0, %1, %cst {dimension_numbers = #tpu.dot_dimension_numbers<[1], [0], [0], [1], [0, 0, 1, 1], [], []>} : vector<2x128xf32>, vector<128x768xf32>, vector<2x768xf32> -> vector<2x768xf32>
    %c0_3 = arith.constant 0 : index
    %c0_4 = arith.constant 0 : index
    %3 = vector.load %arg2[%c0_3, %c0_4] : memref<1x768xf32, #tpu.memory_space<vmem>>, vector<1x768xf32>
    %4 = vector.broadcast %3 : vector<1x768xf32> to vector<2x768xf32>
    %5 = arith.addf %2, %4 : vector<2x768xf32>
    %cst_5 = arith.constant 0.000000e+00 : f32
    %6 = vector.broadcast %cst_5 : f32 to vector<2x768xf32>
    %7 = arith.maximumf %5, %6 : vector<2x768xf32>
    %c0_6 = arith.constant 0 : index
    %c0_7 = arith.constant 0 : index
    %8 = vector.load %arg3[%c0_6, %c0_7] : memref<768x128xf32, #tpu.memory_space<vmem>>, vector<768x128xf32>
    %cst_8 = arith.constant dense<0.000000e+00> : vector<2x128xf32>
    %9 = tpu.matmul %7, %8, %cst_8 {dimension_numbers = #tpu.dot_dimension_numbers<[1], [0], [0], [1], [0, 0, 1, 1], [], []>} : vector<2x768xf32>, vector<768x128xf32>, vector<2x128xf32> -> vector<2x128xf32>
    %c0_9 = arith.constant 0 : index
    %c0_10 = arith.constant 0 : index
    %10 = vector.load %arg4[%c0_9, %c0_10] : memref<1x128xf32, #tpu.memory_space<vmem>>, vector<1x128xf32>
    %11 = vector.broadcast %10 : vector<1x128xf32> to vector<2x128xf32>
    %12 = arith.addf %9, %11 : vector<2x128xf32>
    %c0_11 = arith.constant 0 : index
    %c0_12 = arith.constant 0 : index
    %13 = vector.load %arg5[%c0_11, %c0_12] : memref<2x128xf32, #tpu.memory_space<vmem>>, vector<2x128xf32>
    tpu.vector_store %arg5[%c0_11, %c0_12], %12 {strides = array<i32>} : memref<2x128xf32, #tpu.memory_space<vmem>>, vector<2x128xf32>,
    return
  }
}

</mosaic_0001>

<bundles_post_ra>
// kernel: model11_forward.1
= control target key start
LH: loop header
LB: loop body
LE: loop exit
PB: predicated region body
PF: predicated region fallthrough
CT: control target
= control target key end

     0   :  { %10 = vsyncpa [#allocation3], 0  ;;  %s952_s0 = inlined_call_operand.vmem [shape: f32[2,128], index: 0, kind: input, shape index: {}]   ;;  %s953_s1 = inlined_call_operand.hbm [shape: f32[128,768], index: 1, kind: input, shape index: {}]   ;;  %s954_s2 = inlined_call_operand.vmem [shape: f32[1,768], index: 2, kind: input, shape index: {}]   ;;  %s955_s3 = inlined_call_operand.hbm [shape: f32[768,128], index: 3, kind: input, shape index: {}]   ;;  %s956_s4 = inlined_call_operand.vmem [shape: f32[1,128], index: 4, kind: input, shape index: {}]   ;;  %s957_s5 = inlined_call_operand.vmem [shape: f32[2,128], index: 5, kind: output, shape index: {}]  }
   0x1   :  { %11 = vsyncpa [#allocation5], 0  ;;  %s873_s18 = smov [#allocation2]  }
   0x2   :  { %s19_s19 = sshll.u32 %s873_s18, 4  ;;  %s20_s19 = int_to_ptr.vmem [resolvable:$true] %s19_s19 }
   0x3   :  { %s837_s20 = scalar_lea.vmem %s20_s19, 12288  ;;  %p842_p1 = scmp.lt.s32.totalorder %s20_s19, %s20_s19 }
   0x4   :  { %p838_p0 = scmp.ne.s32.totalorder %s20_s19, %s837_s20  ;;  %p843_p2 = scmp.lt.s32.totalorder %s837_s20, %s837_s20 }
   0x6   :  { %p844_p3 = por %p843_p2, %p842_p1 }
   0x8   :  { %p845_p4 = pnand %p844_p3, %p838_p0 }
   0xa   :  { %848 = shalt.err (!%p845_p4)
}
   0xb   :  { %s874_s21 = smov 768   ;;  %s875_s22 = smov 48  }
   0xc   :  { %25 = dma.hbm_to_vmem [thread:$0]  %s953_s1, 12288, %s20_s19, [#allocation3], %s874_s21, %s874_s21, %s875_s22  }
   0xd   :  { %s876_s25 = smov [#allocation4]  }
   0xe   :  { %s33_s26 = sshll.u32 %s876_s25, 4  ;;  %s34_s26 = int_to_ptr.vmem [resolvable:$true] %s33_s26 }
   0xf   :  { %s857_s27 = scalar_lea.vmem %s34_s26, 12288  ;;  %p862_p6 = scmp.lt.s32.totalorder %s34_s26, %s34_s26 }
  0x10   :  { %p858_p5 = scmp.ne.s32.totalorder %s34_s26, %s857_s27  ;;  %p863_p7 = scmp.lt.s32.totalorder %s857_s27, %s857_s27 }
  0x12   :  { %p864_p8 = por %p863_p7, %p862_p6 }
  0x14   :  { %p865_p9 = pnand %p864_p8, %p858_p5 }
  0x16   :  { %868 = shalt.err (!%p865_p9)
}
  0x17   :  { %s877_s28 = smov 128   ;;  %s878_s29 = smov 8  }
  0x18   :  { %39 = dma.hbm_to_vmem [thread:$0]  %s955_s3, 12288, %s34_s26, [#allocation5], %s877_s28, %s877_s28, %s878_s29  }
  0x19   :  { %869 = dma.done.wait [#allocation3], 12288  }
  0x1a   :  { %870 = vsyncadd [#allocation3], 4294955008 }
  0x1b   :  { %871 = dma.done.wait [#allocation5], 12288  }
  0x1c   :  { %872 = vsyncadd [#allocation5], 4294955008  ;;  %v879_v0 = vmov 0.0   ;;  %v140_v1 = vld [vmem:[#allocation2 + $0x2d8] sm:$0xff]  ;;  %v139_v2 = vld [vmem:[#allocation2 + $0x2d0] sm:$0xff] }
  0x1d   :  { %241 = vmatprep.mubr.f32.mxu0 %v879_v0  ;;  %312 = vmatprep.mubr.f32.mxu1 %v879_v0  ;;  %v134_v3 = vld [vmem:[#allocation2 + $0x2a8] sm:$0xff]  ;;  %v133_v5 = vld [vmem:[#allocation2 + $0x2a0] sm:$0xff]  ;;  %v128_v7 = vld [vmem:[#allocation2 + $0x278] sm:$0xff] }
  0x1e   :  { %177 = vmatprep.subr.mxu0 %v140_v1  ;;  %v142_v4 = vld [vmem:[#allocation2 + $0x2e8] sm:$0xff]  ;;  %v141_v6 = vld [vmem:[#allocation2 + $0x2e0] sm:$0xff]  ;;  %v136_v8 = vld [vmem:[#allocation2 + $0x2b8] sm:$0xff] }
  0x1f   :  { %178 = vmatpush1.msra.mxu0 %v139_v2  ;;  %248 = vmatprep.subr.mxu1 %v142_v4  ;;  %v127_v9 = vld [vmem:[#allocation2 + $0x270] sm:$0xff]  ;;  %v130_v11 = vld [vmem:[#allocation2 + $0x288] sm:$0xff]  ;;  %v129_v13 = vld [vmem:[#allocation2 + $0x280] sm:$0xff] }
  0x20   :  { %179 = vmatprep.subr.mxu0 %v134_v3  ;;  %249 = vmatpush1.msra.mxu1 %v141_v6  ;;  %v135_v10 = vld [vmem:[#allocation2 + $0x2b0] sm:$0xff]  ;;  %v122_v12 = vld [vmem:[#allocation2 + $0x248] sm:$0xff]  ;;  %v121_v14 = vld [vmem:[#allocation2 + $0x240] sm:$0xff] }
  0x21   :  { %180 = vmatpush1.msra.mxu0 %v133_v5  ;;  %250 = vmatprep.subr.mxu1 %v136_v8  ;;  %v124_v15 = vld [vmem:[#allocation2 + $0x258] sm:$0xff]  ;;  %v123_v17 = vld [vmem:[#allocation2 + $0x250] sm:$0xff]  ;;  %v118_v19 = vld [vmem:[#allocation2 + $0x228] sm:$0xff] }
  0x22   :  { %181 = vmatprep.subr.mxu0 %v128_v7  ;;  %251 = vmatpush1.msra.mxu1 %v135_v10  ;;  %v116_v16 = vld [vmem:[#allocation2 + $0x218] sm:$0xff]  ;;  %v115_v18 = vld [vmem:[#allocation2 + $0x210] sm:$0xff]  ;;  %v110_v20 = vld [vmem:[#allocation2 + $0x1e8] sm:$0xff] }
  0x23   :  { %182 = vmatpush1.msra.mxu0 %v127_v9  ;;  %252 = vmatprep.subr.mxu1 %v130_v11  ;;  %v117_v21 = vld [vmem:[#allocation2 + $0x220] sm:$0xff]  ;;  %v112_v23 = vld [vmem:[#allocation2 + $0x1f8] sm:$0xff]  ;;  %v111_v25 = vld [vmem:[#allocation2 + $0x1f0] sm:$0xff] }
  0x24   :  { %183 = vmatprep.subr.mxu0 %v122_v12  ;;  %253 = vmatpush1.msra.mxu1 %v129_v13  ;;  %v109_v22 = vld [vmem:[#allocation2 + $0x1e0] sm:$0xff]  ;;  %v104_v24 = vld [vmem:[#allocation2 + $0x1b8] sm:$0xff]  ;;  %v103_v26 = vld [vmem:[#allocation2 + $0x1b0] sm:$0xff] }
  0x25   :  { %184 = vmatpush1.msra.mxu0 %v121_v14  ;;  %254 = vmatprep.subr.mxu1 %v124_v15  ;;  %v106_v27 = vld [vmem:[#allocation2 + $0x1c8] sm:$0xff]  ;;  %v105_v29 = vld [vmem:[#allocation2 + $0x1c0] sm:$0xff]  ;;  %v100_v31 = vld [vmem:[#allocation2 + $0x198] sm:$0xff] }
  0x26   :  { %185 = vmatprep.subr.mxu0 %v116_v16  ;;  %255 = vmatpush1.msra.mxu1 %v123_v17  ;;  %v98_v28 = vld [vmem:[#allocation2 + $0x188] sm:$0xff]  ;;  %v97_v30 = vld [vmem:[#allocation2 + $0x180] sm:$0xff]  ;;  %v92_v32 = vld [vmem:[#allocation2 + $0x158] sm:$0xff] }
  0x27   :  { %186 = vmatpush1.msra.mxu0 %v115_v18  ;;  %256 = vmatprep.subr.mxu1 %v118_v19  ;;  %v99_v33 = vld [vmem:[#allocation2 + $0x190] sm:$0xff]  ;;  %v94_v35 = vld [vmem:[#allocation2 + $0x168] sm:$0xff]  ;;  %v93_v37 = vld [vmem:[#allocation2 + $0x160] sm:$0xff] }
  0x28   :  { %187 = vmatprep.subr.mxu0 %v110_v20  ;;  %257 = vmatpush1.msra.mxu1 %v117_v21  ;;  %v91_v34 = vld [vmem:[#allocation2 + $0x150] sm:$0xff]  ;;  %v86_v36 = vld [vmem:[#allocation2 + $0x128] sm:$0xff]  ;;  %v85_v38 = vld [vmem:[#allocation2 + $0x120] sm:$0xff] }
  0x29   :  { %188 = vmatpush1.msra.mxu0 %v109_v22  ;;  %258 = vmatprep.subr.mxu1 %v112_v23  ;;  %v88_v39 = vld [vmem:[#allocation2 + $0x138] sm:$0xff]  ;;  %v87_v41 = vld [vmem:[#allocation2 + $0x130] sm:$0xff]  ;;  %v82_v43 = vld [vmem:[#allocation2 + $0x108] sm:$0xff] }
  0x2a   :  { %189 = vmatprep.subr.mxu0 %v104_v24  ;;  %259 = vmatpush1.msra.mxu1 %v111_v25  ;;  %v80_v40 = vld [vmem:[#allocation2 + $0xf8] sm:$0xff]  ;;  %v79_v42 = vld [vmem:[#allocation2 + $0xf0] sm:$0xff]  ;;  %v74_v44 = vld [vmem:[#allocation2 + $0xc8] sm:$0xff] }
  0x2b   :  { %190 = vmatpush1.msra.mxu0 %v103_v26  ;;  %260 = vmatprep.subr.mxu1 %v106_v27  ;;  %v81_v45 = vld [vmem:[#allocation2 + $0x100] sm:$0xff]  ;;  %v76_v47 = vld [vmem:[#allocation2 + $0xd8] sm:$0xff]  ;;  %v75_v49 = vld [vmem:[#allocation2 + $0xd0] sm:$0xff] }
  0x2c   :  { %191 = vmatprep.subr.mxu0 %v98_v28  ;;  %261 = vmatpush1.msra.mxu1 %v105_v29  ;;  %v73_v46 = vld [vmem:[#allocation2 + $0xc0] sm:$0xff]  ;;  %v68_v48 = vld [vmem:[#allocation2 + $0x98] sm:$0xff]  ;;  %v67_v50 = vld [vmem:[#allocation2 + $0x90] sm:$0xff] }
  0x2d   :  { %192 = vmatpush1.msra.mxu0 %v97_v30  ;;  %262 = vmatprep.subr.mxu1 %v100_v31  ;;  %v70_v51 = vld [vmem:[#allocation2 + $0xa8] sm:$0xff]  ;;  %v69_v53 = vld [vmem:[#allocation2 + $0xa0] sm:$0xff]  ;;  %v64_v55 = vld [vmem:[#allocation2 + $0x78] sm:$0xff] }
  0x2e   :  { %193 = vmatprep.subr.mxu0 %v92_v32  ;;  %263 = vmatpush1.msra.mxu1 %v99_v33  ;;  %v62_v52 = vld [vmem:[#allocation2 + $0x68] sm:$0xff]  ;;  %v61_v54 = vld [vmem:[#allocation2 + $0x60] sm:$0xff]  ;;  %v56_v56 = vld [vmem:[#allocation2 + $0x38] sm:$0xff] }
  0x2f   :  { %194 = vmatpush1.msra.mxu0 %v91_v34  ;;  %264 = vmatprep.subr.mxu1 %v94_v35  ;;  %v63_v57 = vld [vmem:[#allocation2 + $0x70] sm:$0xff]  ;;  %v58_v59 = vld [vmem:[#allocation2 + $0x48] sm:$0xff]  ;;  %v57_v61 = vld [vmem:[#allocation2 + $0x40] sm:$0xff] }
  0x30   :  { %195 = vmatprep.subr.mxu0 %v86_v36  ;;  %265 = vmatpush1.msra.mxu1 %v93_v37  ;;  %v55_v58 = vld [vmem:[#allocation2 + $0x30] sm:$0xff]  ;;  %v50_v60 = vld [vmem:[#allocation2 + $0x8] sm:$0xff]  ;;  %v49_v62 = vld [vmem:[#allocation2] sm:$0xff] }
  0x31   :  { %196 = vmatpush1.msra.mxu0 %v85_v38  ;;  %266 = vmatprep.subr.mxu1 %v88_v39  ;;  %v52_v63 = vld [vmem:[#allocation2 + $0x18] sm:$0xff]  ;;  %v921_v1 = vld [vmem:[%s952_s0] sm:$0x3]  ;;  %v51_v3 = vld [vmem:[#allocation2 + $0x10] sm:$0xff] }
  0x32   :  { %197 = vmatprep.subr.mxu0 %v80_v40  ;;  %267 = vmatpush1.msra.mxu1 %v87_v41  ;;  %v144_v2 = vld [vmem:[#allocation2 + $0x2f8] sm:$0xff]  ;;  %v143_v4 = vld [vmem:[#allocation2 + $0x2f0] sm:$0xff]  ;;  %v138_v5 = vld [vmem:[#allocation2 + $0x2c8] sm:$0xff] }
  0x33   :  { %198 = vmatpush1.msra.mxu0 %v79_v42  ;;  %268 = vmatprep.subr.mxu1 %v82_v43  ;;  %v137_v6 = vld [vmem:[#allocation2 + $0x2c0] sm:$0xff]  ;;  %v132_v7 = vld [vmem:[#allocation2 + $0x298] sm:$0xff]  ;;  %v131_v9 = vld [vmem:[#allocation2 + $0x290] sm:$0xff] }
  0x34   :  { %199 = vmatprep.subr.mxu0 %v74_v44  ;;  %269 = vmatpush1.msra.mxu1 %v81_v45  ;;  %v427_v8 = vld [vmem:[#allocation4 + $0xf8] sm:$0xff]  ;;  %v126_v11 = vld [vmem:[#allocation2 + $0x268] sm:$0xff]  ;;  %v426_v12 = vld [vmem:[#allocation4 + $0xf0] sm:$0xff] }
  0x35   :  { %200 = vmatpush1.msra.mxu0 %v73_v46  ;;  %270 = vmatprep.subr.mxu1 %v76_v47  ;;  %v411_v10 = vld [vmem:[#allocation4 + $0x78] sm:$0xff]  ;;  %v125_v13 = vld [vmem:[#allocation2 + $0x260] sm:$0xff]  ;;  %v410_v14 = vld [vmem:[#allocation4 + $0x70] sm:$0xff] }
  0x36   :  { %201 = vmatprep.subr.mxu0 %v68_v48  ;;  %271 = vmatpush1.msra.mxu1 %v75_v49  ;;  %v120_v15 = vld [vmem:[#allocation2 + $0x238] sm:$0xff]  ;;  %v425_v16 = vld [vmem:[#allocation4 + $0xe8] sm:$0xff]  ;;  %v119_v17 = vld [vmem:[#allocation2 + $0x230] sm:$0xff] }
  0x37   :  { %202 = vmatpush1.msra.mxu0 %v67_v50  ;;  %272 = vmatprep.subr.mxu1 %v70_v51  ;;  %v409_v18 = vld [vmem:[#allocation4 + $0x68] sm:$0xff]  ;;  %v424_v20 = vld [vmem:[#allocation4 + $0xe0] sm:$0xff]  ;;  %v108_v22 = vld [vmem:[#allocation2 + $0x1d8] sm:$0xff] }
  0x38   :  { %203 = vmatprep.subr.mxu0 %v62_v52  ;;  %273 = vmatpush1.msra.mxu1 %v69_v53  ;;  %v114_v19 = vld [vmem:[#allocation2 + $0x208] sm:$0xff]  ;;  %v113_v21 = vld [vmem:[#allocation2 + $0x200] sm:$0xff]  ;;  %v423_v23 = vld [vmem:[#allocation4 + $0xd8] sm:$0xff] }
  0x39   :  { %204 = vmatpush1.msra.mxu0 %v61_v54  ;;  %274 = vmatprep.subr.mxu1 %v64_v55  ;;  %v107_v24 = vld [vmem:[#allocation2 + $0x1d0] sm:$0xff]  ;;  %v407_v25 = vld [vmem:[#allocation4 + $0x58] sm:$0xff]  ;;  %v102_v26 = vld [vmem:[#allocation2 + $0x1a8] sm:$0xff] }
  0x3a   :  { %205 = vmatprep.subr.mxu0 %v56_v56  ;;  %275 = vmatpush1.msra.mxu1 %v63_v57  ;;  %v422_v27 = vld [vmem:[#allocation4 + $0xd0] sm:$0xff]  ;;  %v101_v28 = vld [vmem:[#allocation2 + $0x1a0] sm:$0xff]  ;;  %v96_v30 = vld [vmem:[#allocation2 + $0x178] sm:$0xff] }
  0x3b   :  { %206 = vmatpush1.msra.mxu0 %v55_v58  ;;  %276 = vmatprep.subr.mxu1 %v58_v59  ;;  %v406_v29 = vld [vmem:[#allocation4 + $0x50] sm:$0xff]  ;;  %v421_v31 = vld [vmem:[#allocation4 + $0xc8] sm:$0xff]  ;;  %v420_v35 = vld [vmem:[#allocation4 + $0xc0] sm:$0xff] }
  0x3c   :  { %207 = vmatprep.subr.mxu0 %v50_v60  ;;  %277 = vmatpush1.msra.mxu1 %v57_v61  ;;  %v95_v32 = vld [vmem:[#allocation2 + $0x170] sm:$0xff]  ;;  %v405_v33 = vld [vmem:[#allocation4 + $0x48] sm:$0xff]  ;;  %v89_v36 = vld [vmem:[#allocation2 + $0x140] sm:$0xff] }
  0x3d   :  { %208 = vmatpush1.msra.mxu0 %v49_v62  ;;  %278 = vmatprep.subr.mxu1 %v52_v63  ;;  %v90_v34 = vld [vmem:[#allocation2 + $0x148] sm:$0xff]  ;;  %v404_v37 = vld [vmem:[#allocation4 + $0x40] sm:$0xff]  ;;  %v84_v38 = vld [vmem:[#allocation2 + $0x118] sm:$0xff] }
  0x3e   :  { %242 = vmatmul.mubr.f32.vlgmr.msra.gmra.mxu0 %v921_v1  ;;  %319 = vmatprep.subr.mxu0 %v144_v2  ;;  %v419_v39 = vld [vmem:[#allocation4 + $0xb8] sm:$0xff]  ;;  %v83_v40 = vld [vmem:[#allocation2 + $0x110] sm:$0xff]  ;;  %v78_v42 = vld [vmem:[#allocation2 + $0xe8] sm:$0xff] }
  0x3f   :  { %279 = vmatpush1.msra.mxu1 %v51_v3  ;;  %320 = vmatpush1.msra.mxu0 %v143_v4  ;;  %v403_v41 = vld [vmem:[#allocation4 + $0x38] sm:$0xff]  ;;  %v418_v43 = vld [vmem:[#allocation4 + $0xb0] sm:$0xff]  ;;  %v77_v44 = vld [vmem:[#allocation2 + $0xe0] sm:$0xff] }
  0x40   :  { %313 = vmatmul.mubr.f32.vlgmr.msra.gmra.mxu1 %v921_v1  ;;  %321 = vmatprep.subr.mxu0 %v138_v5  ;;  %v402_v45 = vld [vmem:[#allocation4 + $0x30] sm:$0xff]  ;;  %v72_v46 = vld [vmem:[#allocation2 + $0xb8] sm:$0xff]  ;;  %v417_v47 = vld [vmem:[#allocation4 + $0xa8] sm:$0xff] }
  0x41   :  { %322 = vmatpush1.msra.mxu0 %v137_v6  ;;  %383 = vmatprep.mubr.f32.mxu0 %v879_v0  ;;  %v408_v0 = vld [vmem:[#allocation4 + $0x60] sm:$0xff]  ;;  %v71_v48 = vld [vmem:[#allocation2 + $0xb0] sm:$0xff]  ;;  %v401_v49 = vld [vmem:[#allocation4 + $0x28] sm:$0xff] }
  0x42   :  { %323 = vmatprep.subr.mxu0 %v132_v7  ;;  %717 = vmatprep.subr.mxu1 %v427_v8  ;;  %v66_v50 = vld [vmem:[#allocation2 + $0x88] sm:$0xff]  ;;  %v416_v51 = vld [vmem:[#allocation4 + $0xa0] sm:$0xff]  ;;  %v60_v54 = vld [vmem:[#allocation2 + $0x58] sm:$0xff] }
  0x43   :  { %324 = vmatpush1.msra.mxu0 %v131_v9  ;;  %718 = vmatpush3.msra.mxu1 %v411_v10  ;;  %v65_v52 = vld [vmem:[#allocation2 + $0x80] sm:$0xff]  ;;  %v59_v55 = vld [vmem:[#allocation2 + $0x50] sm:$0xff]  ;;  %v54_v56 = vld [vmem:[#allocation2 + $0x28] sm:$0xff] }
  0x44   :  { %325 = vmatprep.subr.mxu0 %v126_v11  ;;  %719 = vmatprep.subr.mxu1 %v426_v12  ;;  %v400_v53 = vld [vmem:[#allocation4 + $0x20] sm:$0xff]  ;;  %v459_v58 = vld [vmem:[#allocation4 + $0x1f8] sm:$0xff]  ;;  %v458_v60 = vld [vmem:[#allocation4 + $0x1f0] sm:$0xff] }
  0x45   :  { %326 = vmatpush1.msra.mxu0 %v125_v13  ;;  %720 = vmatpush3.msra.mxu1 %v410_v14  ;;  %v53_v57 = vld [vmem:[#allocation2 + $0x20] sm:$0xff]  ;;  %v443_v59 = vld [vmem:[#allocation4 + $0x178] sm:$0xff]  ;;  %v442_v61 = vld [vmem:[#allocation4 + $0x170] sm:$0xff] }
  0x46   :  { %327 = vmatprep.subr.mxu0 %v120_v15  ;;  %721 = vmatprep.subr.mxu1 %v425_v16  ;;  %v457_v62 = vld [vmem:[#allocation4 + $0x1e8] sm:$0xff]  ;;  %v456_v2 = vld [vmem:[#allocation4 + $0x1e0] sm:$0xff]  ;;  %v455_v4 = vld [vmem:[#allocation4 + $0x1d8] sm:$0xff] }
  0x47   :  { %328 = vmatpush1.msra.mxu0 %v119_v17  ;;  %722 = vmatpush3.msra.mxu1 %v409_v18  ;;  %v441_v63 = vld [vmem:[#allocation4 + $0x168] sm:$0xff]  ;;  %v440_v3 = vld [vmem:[#allocation4 + $0x160] sm:$0xff]  ;;  %v439_v5 = vld [vmem:[#allocation4 + $0x158] sm:$0xff] }
  0x48   :  { %329 = vmatprep.subr.mxu0 %v114_v19  ;;  %723 = vmatprep.subr.mxu1 %v424_v20  ;;  %v454_v6 = vld [vmem:[#allocation4 + $0x1d0] sm:$0xff]  ;;  %v437_v8 = vld [vmem:[#allocation4 + $0x148] sm:$0xff]  ;;  %v452_v9 = vld [vmem:[#allocation4 + $0x1c0] sm:$0xff] }
  0x49   :  { %330 = vmatpush1.msra.mxu0 %v113_v21  ;;  %724 = vmatpush3.msra.mxu1 %v408_v0  ;;  %v438_v7 = vld [vmem:[#allocation4 + $0x150] sm:$0xff]  ;;  %v436_v10 = vld [vmem:[#allocation4 + $0x140] sm:$0xff]  ;;  %v451_v11 = vld [vmem:[#allocation4 + $0x1b8] sm:$0xff] }
  0x4a   :  { %331 = vmatprep.subr.mxu0 %v108_v22  ;;  %725 = vmatprep.subr.mxu1 %v423_v23  ;;  %v435_v12 = vld [vmem:[#allocation4 + $0x138] sm:$0xff]  ;;  %v450_v13 = vld [vmem:[#allocation4 + $0x1b0] sm:$0xff]  ;;  %v449_v15 = vld [vmem:[#allocation4 + $0x1a8] sm:$0xff] }
  0x4b   :  { %332 = vmatpush1.msra.mxu0 %v107_v24  ;;  %726 = vmatpush3.msra.mxu1 %v407_v25  ;;  %v434_v14 = vld [vmem:[#allocation4 + $0x130] sm:$0xff]  ;;  %v433_v16 = vld [vmem:[#allocation4 + $0x128] sm:$0xff]  ;;  %v415_v17 = vld [vmem:[#allocation4 + $0x98] sm:$0xff] }
  0x4c   :  { %333 = vmatprep.subr.mxu0 %v102_v26  ;;  %727 = vmatprep.subr.mxu1 %v422_v27  ;;  %v448_v18 = vld [vmem:[#allocation4 + $0x1a0] sm:$0xff]  ;;  %v399_v19 = vld [vmem:[#allocation4 + $0x18] sm:$0xff]  ;;  %v414_v21 = vld [vmem:[#allocation4 + $0x90] sm:$0xff] }
  0x4d   :  { %334 = vmatpush1.msra.mxu0 %v101_v28  ;;  %728 = vmatpush3.msra.mxu1 %v406_v29  ;;  %v432_v20 = vld [vmem:[#allocation4 + $0x120] sm:$0xff]  ;;  %v447_v0 = vld [vmem:[#allocation4 + $0x198] sm:$0xff]  ;;  %v398_v22 = vld [vmem:[#allocation4 + $0x10] sm:$0xff] }
  0x4e   :  { %335 = vmatprep.subr.mxu0 %v96_v30  ;;  %729 = vmatprep.subr.mxu1 %v421_v31  ;;  %v431_v23 = vld [vmem:[#allocation4 + $0x118] sm:$0xff]  ;;  %v413_v24 = vld [vmem:[#allocation4 + $0x88] sm:$0xff]  ;;  %v446_v25 = vld [vmem:[#allocation4 + $0x190] sm:$0xff] }
  0x4f   :  { %336 = vmatpush1.msra.mxu0 %v95_v32  ;;  %730 = vmatpush3.msra.mxu1 %v405_v33  ;;  %v397_v26 = vld [vmem:[#allocation4 + $0x8] sm:$0xff]  ;;  %v430_v27 = vld [vmem:[#allocation4 + $0x110] sm:$0xff]  ;;  %v412_v28 = vld [vmem:[#allocation4 + $0x80] sm:$0xff] }
  0x50   :  { %337 = vmatprep.subr.mxu0 %v90_v34  ;;  %731 = vmatprep.subr.mxu1 %v420_v35  ;;  %v445_v29 = vld [vmem:[#allocation4 + $0x188] sm:$0xff]  ;;  %v396_v30 = vld [vmem:[#allocation4] sm:$0xff]  ;;  %v491_v33 = vld [vmem:[#allocation4 + $0x2f8] sm:$0xff]  ;;  %v147_v35 = vlaneseq }
  0x51   :  { %338 = vmatpush1.msra.mxu0 %v89_v36  ;;  %732 = vmatpush3.msra.mxu1 %v404_v37  ;;  %v429_v31 = vld [vmem:[#allocation4 + $0x108] sm:$0xff]  ;;  %v444_v32 = vld [vmem:[#allocation4 + $0x180] sm:$0xff] }
  0x52   :  { %339 = vmatprep.subr.mxu0 %v84_v38  ;;  %733 = vmatprep.subr.mxu1 %v419_v39  ;;  %v428_v34 = vld [vmem:[#allocation4 + $0x100] sm:$0xff]  ;;  %v927_v36 = vshrl.u32 %v147_v35, 7 }
  0x53   :  { %340 = vmatpush1.msra.mxu0 %v83_v40  ;;  %734 = vmatpush3.msra.mxu1 %v403_v41  ;;  %v933_v38 = vld [vmem:[%s954_s2] sm:$0x3f] }
  0x54   :  { %341 = vmatprep.subr.mxu0 %v78_v42  ;;  %735 = vmatprep.subr.mxu1 %v418_v43  ;;  %v149_v37 = vsub.s32 0, %v927_v36  ;;  %v153_v39 = vsub.s32 1, %v927_v36  ;;  %v157_v40 = vsub.s32 2, %v927_v36  ;;  %v161_v41 = vsub.s32 3, %v927_v36 }
  0x55   :  { %342 = vmatpush1.msra.mxu0 %v77_v44  ;;  %736 = vmatpush3.msra.mxu1 %v402_v45 }
  0x56   :  { %343 = vmatprep.subr.mxu0 %v72_v46  ;;  %737 = vmatprep.subr.mxu1 %v417_v47  ;;  %v150_v42 = vrot.slane %v933_v38, %v149_v37  ;;  %v154_v43 = vrot.slane %v933_v38, %v153_v39  ;;  %v158_v44 = vrot.slane %v933_v38, %v157_v40  ;;  %v716_v39 = vld [vmem:[%s956_s4] ss:$0 sm:$0xff] }
  0x57   :  { %344 = vmatpush1.msra.mxu0 %v71_v48  ;;  %738 = vmatpush3.msra.mxu1 %v401_v49  ;;  %v162_v46 = vrot.slane %v933_v38, %v161_v41 }
  0x58   :  { %345 = vmatprep.subr.mxu0 %v66_v50  ;;  %739 = vmatprep.subr.mxu1 %v416_v51 }
  0x59   :  { %346 = vmatpush1.msra.mxu0 %v65_v52  ;;  %740 = vmatpush3.msra.mxu1 %v400_v53 }
  0x5a   :  { %347 = vmatprep.subr.mxu0 %v60_v54  ;;  %741 = vmatprep.subr.mxu1 %v415_v17  ;;  %v480_v17 = vld [vmem:[#allocation4 + $0x2a0] sm:$0xff] }
  0x5b   :  { %348 = vmatpush1.msra.mxu0 %v59_v55  ;;  %742 = vmatpush3.msra.mxu1 %v399_v19  ;;  %v464_v19 = vld [vmem:[#allocation4 + $0x220] sm:$0xff] }
  0x5c   :  { %349 = vmatprep.subr.mxu0 %v54_v56  ;;  %743 = vmatprep.subr.mxu1 %v414_v21 }
  0x5d   :  { %350 = vmatpush1.msra.mxu0 %v53_v57  ;;  %744 = vmatpush3.msra.mxu1 %v398_v22  ;;  %v475_v57 = vld [vmem:[#allocation4 + $0x278] sm:$0xff] }
  0x5e   :  { %384 = vmatmul.mubr.f32.vlgmr.msra.gmra.mxu0 %v921_v1  ;;  %752 = vmatprep.subr.mxu0 %v459_v58  ;;  %v453_v1 = vld [vmem:[#allocation4 + $0x1c8] sm:$0xff] }
  0x5f   :  { %753 = vmatpush3.msra.mxu0 %v443_v59  ;;  %745 = vmatprep.subr.mxu1 %v413_v24  ;;  %v490_v59 = vld [vmem:[#allocation4 + $0x2f0] sm:$0xff] }
  0x60   :  { %754 = vmatprep.subr.mxu0 %v458_v60  ;;  %746 = vmatpush3.msra.mxu1 %v397_v26  ;;  %v474_v60 = vld [vmem:[#allocation4 + $0x270] sm:$0xff]  ;;  %v477_v26 = vld [vmem:[#allocation4 + $0x288] sm:$0xff] }
  0x61   :  { %755 = vmatpush3.msra.mxu0 %v442_v61  ;;  %747 = vmatprep.subr.mxu1 %v412_v28  ;;  %v489_v61 = vld [vmem:[#allocation4 + $0x2e8] sm:$0xff] }
  0x62   :  { %756 = vmatprep.subr.mxu0 %v457_v62  ;;  %748 = vmatpush3.msra.mxu1 %v396_v30  ;;  %v473_v62 = vld [vmem:[#allocation4 + $0x268] sm:$0xff] }
  0x63   :  { %757 = vmatpush3.msra.mxu0 %v441_v63  ;;  %787 = vmatprep.subr.mxu1 %v491_v33  ;;  %v488_v63 = vld [vmem:[#allocation4 + $0x2e0] sm:$0xff] }
  0x64   :  { %758 = vmatprep.subr.mxu0 %v456_v2  ;;  %v472_v2 = vld [vmem:[#allocation4 + $0x260] sm:$0xff] }
  0x65   :  { %759 = vmatpush3.msra.mxu0 %v440_v3  ;;  %v487_v3 = vld [vmem:[#allocation4 + $0x2d8] sm:$0xff] }
  0x66   :  { %760 = vmatprep.subr.mxu0 %v455_v4  ;;  %v471_v4 = vld [vmem:[#allocation4 + $0x258] sm:$0xff] }
  0x67   :  { %761 = vmatpush3.msra.mxu0 %v439_v5  ;;  %v486_v5 = vld [vmem:[#allocation4 + $0x2d0] sm:$0xff] }
  0x68   :  { %762 = vmatprep.subr.mxu0 %v454_v6  ;;  %v470_v6 = vld [vmem:[#allocation4 + $0x250] sm:$0xff] }
  0x69   :  { %763 = vmatpush3.msra.mxu0 %v438_v7  ;;  %v485_v7 = vld [vmem:[#allocation4 + $0x2c8] sm:$0xff] }
  0x6a   :  { %764 = vmatprep.subr.mxu0 %v453_v1  ;;  %v469_v1 = vld [vmem:[#allocation4 + $0x248] sm:$0xff] }
  0x6b   :  { %765 = vmatpush3.msra.mxu0 %v437_v8  ;;  %v484_v8 = vld [vmem:[#allocation4 + $0x2c0] sm:$0xff] }
  0x6c   :  { %766 = vmatprep.subr.mxu0 %v452_v9  ;;  %v468_v9 = vld [vmem:[#allocation4 + $0x240] sm:$0xff] }
  0x6d   :  { %767 = vmatpush3.msra.mxu0 %v436_v10  ;;  %v483_v10 = vld [vmem:[#allocation4 + $0x2b8] sm:$0xff] }
  0x6e   :  { %768 = vmatprep.subr.mxu0 %v451_v11  ;;  %v467_v11 = vld [vmem:[#allocation4 + $0x238] sm:$0xff] }
  0x6f   :  { %769 = vmatpush3.msra.mxu0 %v435_v12  ;;  %v482_v12 = vld [vmem:[#allocation4 + $0x2b0] sm:$0xff] }
  0x70   :  { %770 = vmatprep.subr.mxu0 %v450_v13  ;;  %v466_v13 = vld [vmem:[#allocation4 + $0x230] sm:$0xff] }
  0x71   :  { %771 = vmatpush3.msra.mxu0 %v434_v14  ;;  %v481_v14 = vld [vmem:[#allocation4 + $0x2a8] sm:$0xff] }
  0x72   :  { %772 = vmatprep.subr.mxu0 %v449_v15  ;;  %v465_v15 = vld [vmem:[#allocation4 + $0x228] sm:$0xff] }
  0x73   :  { %773 = vmatpush3.msra.mxu0 %v433_v16  ;;  %v165_v16 = vsub.s32 4, %v927_v36 }
  0x74   :  { %774 = vmatprep.subr.mxu0 %v448_v18  ;;  %v169_v18 = vsub.s32 5, %v927_v36 }
  0x75   :  { %775 = vmatpush3.msra.mxu0 %v432_v20  ;;  %v479_v20 = vld [vmem:[#allocation4 + $0x298] sm:$0xff]  ;;  %v166_v21 = vrot.slane %v933_v38, %v165_v16 }
  0x76   :  { %776 = vmatprep.subr.mxu0 %v447_v0  ;;  %v463_v0 = vld [vmem:[#allocation4 + $0x218] sm:$0xff]  ;;  %v170_v22 = vrot.slane %v933_v38, %v169_v18 }
  0x77   :  { %777 = vmatpush3.msra.mxu0 %v431_v23  ;;  %v478_v23 = vld [vmem:[#allocation4 + $0x290] sm:$0xff] }
  0x78   :  { %778 = vmatprep.subr.mxu0 %v446_v25  ;;  %v462_v25 = vld [vmem:[#allocation4 + $0x210] sm:$0xff] }
  0x79   :  { %779 = vmatpush3.msra.mxu0 %v430_v27 }
  0x7a   :  { %780 = vmatprep.subr.mxu0 %v445_v29  ;;  %v461_v29 = vld [vmem:[#allocation4 + $0x208] sm:$0xff] }
  0x7b   :  { %781 = vmatpush3.msra.mxu0 %v429_v31  ;;  %v476_v31 = vld [vmem:[#allocation4 + $0x280] sm:$0xff] }
  0x7c   :  { %782 = vmatprep.subr.mxu0 %v444_v32  ;;  %v460_v32 = vld [vmem:[#allocation4 + $0x200] sm:$0xff] }
  0x7d   :  { %783 = vmatpush3.msra.mxu0 %v428_v34 }
  0xfe   :  { %v243_v45 = vpop.f32.mrf.mxu0 }
  0xff   :  { %v244_v47 = vadd.f32 %v243_v45, %v150_v42 }
 0x100   :  { %v245_v48 = vpop.f32.mrf.mxu0  ;;  %v314_v49 = vpop.f32.mrf.mxu1 }
 0x101   :  { %v246_v50 = vadd.f32 %v245_v48, %v154_v43  ;;  %v315_v51 = vadd.f32 %v314_v49, %v158_v44  ;;  %v390_v55 = vmax.f32 %v244_v47, 0.0 }
 0x102   :  { %v316_v52 = vpop.f32.mrf.mxu1 }
 0x103   :  { %v391_v53 = vmax.f32 %v246_v50, 0.0  ;;  %v317_v54 = vadd.f32 %v316_v52, %v162_v46  ;;  %v392_v56 = vmax.f32 %v315_v51, 0.0 }
 0x105   :  { %v393_v58 = vmax.f32 %v317_v54, 0.0  ;;  %563 = vmatprep.mubr.f32.mxu1 %v391_v53 }
 0x106   :  { %564 = vmatmul.mubr.f32.vlgmr.msra.gmra.mxu1 %v390_v55 }
 0x107   :  { %633 = vmatprep.mubr.f32.mxu0 %v393_v58  ;;  %788 = vmatpush3.msra.mxu1 %v475_v57 }
 0x108   :  { %634 = vmatmul.mubr.f32.vlgmr.msra.gmra.mxu0 %v392_v56  ;;  %789 = vmatprep.subr.mxu1 %v490_v59 }
 0x109   :  { %790 = vmatpush3.msra.mxu1 %v474_v60 }
 0x10a   :  { %791 = vmatprep.subr.mxu1 %v489_v61 }
 0x10b   :  { %792 = vmatpush3.msra.mxu1 %v473_v62 }
 0x10c   :  { %793 = vmatprep.subr.mxu1 %v488_v63 }
 0x10d   :  { %794 = vmatpush3.msra.mxu1 %v472_v2 }
 0x10e   :  { %795 = vmatprep.subr.mxu1 %v487_v3 }
 0x10f   :  { %796 = vmatpush3.msra.mxu1 %v471_v4 }
 0x110   :  { %797 = vmatprep.subr.mxu1 %v486_v5 }
 0x111   :  { %798 = vmatpush3.msra.mxu1 %v470_v6 }
 0x112   :  { %799 = vmatprep.subr.mxu1 %v485_v7 }
 0x113   :  { %800 = vmatpush3.msra.mxu1 %v469_v1 }
 0x114   :  { %801 = vmatprep.subr.mxu1 %v484_v8 }
 0x115   :  { %802 = vmatpush3.msra.mxu1 %v468_v9 }
 0x116   :  { %803 = vmatprep.subr.mxu1 %v483_v10 }
 0x117   :  { %804 = vmatpush3.msra.mxu1 %v467_v11 }
 0x118   :  { %805 = vmatprep.subr.mxu1 %v482_v12 }
 0x119   :  { %806 = vmatpush3.msra.mxu1 %v466_v13 }
 0x11a   :  { %807 = vmatprep.subr.mxu1 %v481_v14 }
 0x11b   :  { %808 = vmatpush3.msra.mxu1 %v465_v15 }
 0x11c   :  { %809 = vmatprep.subr.mxu1 %v480_v17 }
 0x11d   :  { %810 = vmatpush3.msra.mxu1 %v464_v19 }
 0x11e   :  { %v385_v24 = vpop.f32.mrf.mxu0  ;;  %811 = vmatprep.subr.mxu1 %v479_v20 }
 0x11f   :  { %812 = vmatpush3.msra.mxu1 %v463_v0  ;;  %v386_v27 = vadd.f32 %v385_v24, %v166_v21 }
 0x120   :  { %v387_v28 = vpop.f32.mrf.mxu0  ;;  %813 = vmatprep.subr.mxu1 %v478_v23 }
 0x121   :  { %v388_v30 = vadd.f32 %v387_v28, %v170_v22  ;;  %814 = vmatpush3.msra.mxu1 %v462_v25  ;;  %v394_v34 = vmax.f32 %v386_v27, 0.0 }
 0x122   :  { %815 = vmatprep.subr.mxu1 %v477_v26 }
 0x123   :  { %v395_v33 = vmax.f32 %v388_v30, 0.0  ;;  %816 = vmatpush3.msra.mxu1 %v461_v29 }
 0x124   :  { %817 = vmatprep.subr.mxu1 %v476_v31 }
 0x125   :  { %818 = vmatpush3.msra.mxu1 %v460_v32  ;;  %703 = vmatprep.mubr.f32.mxu1 %v395_v33 }
 0x126   :  { %704 = vmatmul.mubr.f32.vlgmr.msra.gmra.mxu1 %v394_v34 }
 0x1c6   :  { %v749_v35 = vpop.f32.mrf.mxu1 }
 0x1c8   :  { %v750_v36 = vpop.f32.mrf.mxu1  ;;  %v784_v37 = vpop.f32.mrf.mxu0 }
 0x1c9   :  { %v751_v38 = vadd.f32 %v750_v36, %v749_v35 }
 0x1ca   :  { %v785_v40 = vpop.f32.mrf.mxu0 }
 0x1cb   :  { %v566_v41 = vadd.f32 %v751_v38, %v716_v39  ;;  %v786_v42 = vadd.f32 %v785_v40, %v784_v37 }
 0x1cd   :  { %v636_v45 = vadd.f32 %v786_v42, %v566_v41 }
 0x1e6   :  { %v819_v43 = vpop.f32.mrf.mxu1 }
 0x1e8   :  { %v820_v44 = vpop.f32.mrf.mxu1 }
 0x1e9   :  { %v821_v46 = vadd.f32 %v820_v44, %v819_v43 }
 0x1eb   :  { %v706_v47 = vadd.f32 %v821_v46, %v636_v45 }
 0x1ed   :  { %709 = vst [vmem:[%s957_s5] sm:$0x3] %v706_v47 }
 0x1ee   :  { %714 = vsyncpa [#allocation3], 1 }
 0x1ef   :  { %715 = vsyncpa [#allocation5], 1 }

</bundles_post_ra>
